<compile_context>
chip_gen: v5e
topology: v5e:2x2
jax: 0.10.0
libtpu: 0.0.40
codegen_flags: <defaults>
</compile_context>

<pallas_src>
import functools

import jax
import jax.numpy as jnp
from jax.experimental import pallas as pl
from jax.experimental.pallas import tpu as pltpu


def _row_sse_kernel(x_ref, y_ref, c_ref, out_ref, acc_ref):
    """Per grid step: accumulate squared error of a (row_block, lane_block) tile.

    Grid = (row_tiles [parallel], lane_tiles [arbitrary, reduction]).
    acc_ref: (row_block, 128) f32 (or (row_block, 1) when lanes are unaligned),
    reset at lane step 0, flushed (one XLU reduce + per-row weight) at the last
    lane step into the (row_block, 1) output block for this row tile.
    """
    j = pl.program_id(1)

    @pl.when(j == 0)
    def _():
        acc_ref[...] = jnp.zeros_like(acc_ref)

    diff = x_ref[...].astype(jnp.float32) - y_ref[...].astype(jnp.float32)
    sq = diff * diff                                   # (row_block, lane_block)

    lane_block = sq.shape[1]
    if lane_block % 128 == 0:
        # Fold 128-lane chunks into the lane-resident accumulator with pure
        # VPU adds (lane-tile-aligned static slices = vreg selects, no relayout).
        partial = sq[:, 0:128]
        for k in range(1, lane_block // 128):
            partial = partial + sq[:, k * 128:(k + 1) * 128]
        acc_ref[...] += partial                        # (row_block, 128)
    else:
        # Unaligned feature width: single full-width lane reduce per step.
        acc_ref[...] += jnp.sum(sq, axis=1, keepdims=True)   # (row_block, 1)

    @pl.when(j == pl.num_programs(1) - 1)
    def _():
        # Single cross-lane (XLU) reduce per row tile, then apply the baked
        # per-row weight (closed-form time accumulation + 1/(B*T*N) scaling).
        row_sse = jnp.sum(acc_ref[...], axis=1, keepdims=True)   # (row_block, 1)
        out_ref[...] = row_sse * c_ref[...]


def _pick_row_block(rows):
    for c in (512, 256, 128, 64, 32, 16, 8):
        if rows % c == 0:
            return c
    # TODO(synk): pathological row counts (e.g. large primes) fall back to a
    # single full-height block; pad rows to a multiple of 8 if this gets big.
    return rows


def _pick_lane_block(n_feat, row_block):
    if n_feat % 128 != 0:
        return n_feat                     # full-width block (lane-unaligned N)
    budget_elems = (2 << 20) // 4         # <= 2 MiB per input block (v7x-safe)
    for c in (1024, 512, 256, 128):
        if n_feat % c == 0 and row_block * c <= budget_elems:
            return c
    return 128


def time_accumulated_mse_loss(inp, target, *,
                              auxiliary_loss_weight=0.0,
                              accumulate_weight=0.1):
    """Pallas implementation of TimeAccumulatedMSELoss.forward.

    `inp` may be a (prediction, auxiliary_loss) tuple, like the PyTorch module.
    """
    auxiliary_loss = None
    if isinstance(inp, tuple):
        inp, auxiliary_loss = inp

    B, T, C, H, W = inp.shape
    N = C * H * W
    rows = B * T

    # Free, contiguous reshapes -- no HBM transpose.
    x2 = inp.reshape(rows, N)
    y2 = target.reshape(rows, N)

    # Closed-form time-accumulation weights, folded with the 1/(B*T*N) scale:
    #   accumulated mean = sum_{b,t} c_t * SSE[b,t],
    #   c_t = (1 - w^(T-t)) / (1 - w) / (B*T*N)     (row = b*T + t  ->  t = row % T)
    w = float(accumulate_weight)
    if abs(1.0 - w) < 1e-12:
        geo = [float(T - t) for t in range(T)]
    else:
        geo = [(1.0 - w ** (T - t)) / (1.0 - w) for t in range(T)]
    scale = 1.0 / (float(B) * float(T) * float(N))
    c_t = jnp.asarray([g * scale for g in geo], dtype=jnp.float32)       # (T,)
    c_rows = jnp.tile(c_t, B).reshape(rows, 1)                           # (rows, 1)

    row_block = _pick_row_block(rows)
    lane_block = _pick_lane_block(N, row_block)
    acc_lanes = 128 if lane_block % 128 == 0 else 1

    grid = (rows // row_block, N // lane_block)

    out = pl.pallas_call(
        _row_sse_kernel,
        out_shape=jax.ShapeDtypeStruct((rows, 1), jnp.float32),
        grid_spec=pltpu.PrefetchScalarGridSpec(
            num_scalar_prefetch=0,
            grid=grid,
            in_specs=[
                pl.BlockSpec((row_block, lane_block), lambda i, j: (i, j)),
                pl.BlockSpec((row_block, lane_block), lambda i, j: (i, j)),
                pl.BlockSpec((row_block, 1), lambda i, j: (i, 0)),
            ],
            out_specs=pl.BlockSpec((row_block, 1), lambda i, j: (i, 0)),
            scratch_shapes=[
                pltpu.VMEM((row_block, acc_lanes), jnp.float32),
            ],
        ),
        compiler_params=pltpu.CompilerParams(
            # Row axis has no cross-tile dependency (closed-form weights), so it
            # can be sharded across TensorCores; lane axis is the reduction.
            dimension_semantics=("parallel", "arbitrary")),
    )(x2, y2, c_rows)

    loss = jnp.sum(out)   # tiny (rows,) final reduce outside the kernel
    if auxiliary_loss is None:
        return loss
    return loss + auxiliary_loss_weight * auxiliary_loss


def _reference_loss(x, y, auxiliary_loss, auxiliary_loss_weight, accumulate_weight):
    """Pure-JAX reproduction of the exact PyTorch loop (for verification)."""
    loss = jnp.mean((x - y) ** 2, axis=(2, 3, 4))            # (B, T)

    def body(carry, l_t):
        new = l_t + accumulate_weight * carry
        return new, new

    _, accs = jax.lax.scan(body, jnp.zeros(loss.shape[0], loss.dtype),
                           jnp.transpose(loss))               # (T, B)
    total = jnp.mean(accs)
    if auxiliary_loss is None:
        return total
    return total + auxiliary_loss_weight * auxiliary_loss


if __name__ == "__main__":
    B, T, C, H, W = 2, 8, 4, 16, 16
    key = jax.random.PRNGKey(0)
    k1, k2, k3 = jax.random.split(key, 3)

    pred = jax.random.normal(k1, (B, T, C, H, W), dtype=jnp.float32)
    target = jax.random.normal(k2, (B, T, C, H, W), dtype=jnp.float32)
    aux_loss = jax.random.uniform(k3, (), dtype=jnp.float32)

    aux_w = 0.5
    acc_w = 0.1

    out = time_accumulated_mse_loss((pred, aux_loss), target,
                                    auxiliary_loss_weight=aux_w,
                                    accumulate_weight=acc_w)
    out = jax.block_until_ready(out)

    ref = _reference_loss(pred, target, aux_loss, aux_w, acc_w)
    assert jnp.allclose(out, ref, rtol=1e-5, atol=1e-5), (out, ref)

    print("KERNEL_OK")
</pallas_src>

<mosaic_0001>
module attributes {stable_mosaic.version = 11 : i64} {
  func.func @_row_sse_kernel(%arg0: i32, %arg1: i32, %arg2: memref<16x1024xf32, #tpu.memory_space<vmem>>, %arg3: memref<16x1024xf32, #tpu.memory_space<vmem>>, %arg4: memref<16x1xf32, #tpu.memory_space<vmem>>, %arg5: memref<16x1xf32, #tpu.memory_space<vmem>>, %arg6: memref<16x128xf32, #tpu.memory_space<vmem>>) attributes {dimension_semantics = [#tpu.dimension_semantics<parallel>, #tpu.dimension_semantics<arbitrary>], iteration_bounds = array<i64: 1, 1>, scalar_prefetch = 0 : i64, scratch_operands = 1 : i64, tpu.core_type = #tpu.core_type<tc>, window_params = [{transform_indices = @transform_0, window_bounds = array<i64: 16, 1024>}, {transform_indices = @transform_1, window_bounds = array<i64: 16, 1024>}, {transform_indices = @transform_2, window_bounds = array<i64: 16, 1>}, {transform_indices = @transform_3, window_bounds = array<i64: 16, 1>}]} {
    %c0_i32 = arith.constant 0 : i32
    %0 = arith.cmpi eq, %arg1, %c0_i32 : i32
    %1 = arith.extui %0 : i1 to i32
    %c0_i32_0 = arith.constant 0 : i32
    %2 = arith.cmpi ne, %1, %c0_i32_0 : i32
    scf.if %2 {
      %cst = arith.constant 0.000000e+00 : f32
      %28 = vector.broadcast %cst : f32 to vector<16x128xf32>
      %c0_10 = arith.constant 0 : index
      %c0_11 = arith.constant 0 : index
      %29 = vector.load %arg6[%c0_10, %c0_11] : memref<16x128xf32, #tpu.memory_space<vmem>>, vector<16x128xf32>
      tpu.vector_store %arg6[%c0_10, %c0_11], %28 {strides = array<i32>} : memref<16x128xf32, #tpu.memory_space<vmem>>, vector<16x128xf32>,
    } else {
    }
    %c0 = arith.constant 0 : index
    %c0_1 = arith.constant 0 : index
    %3 = vector.load %arg2[%c0, %c0_1] : memref<16x1024xf32, #tpu.memory_space<vmem>>, vector<16x1024xf32>
    %c0_2 = arith.constant 0 : index
    %c0_3 = arith.constant 0 : index
    %4 = vector.load %arg3[%c0_2, %c0_3] : memref<16x1024xf32, #tpu.memory_space<vmem>>, vector<16x1024xf32>
    %5 = arith.subf %3, %4 : vector<16x1024xf32>
    %6 = arith.mulf %5, %5 : vector<16x1024xf32>
    %7 = vector.extract_strided_slice %6 {offsets = [0, 0], sizes = [16, 128], strides = [1, 1]} : vector<16x1024xf32> to vector<16x128xf32>
    %8 = vector.extract_strided_slice %6 {offsets = [0, 128], sizes = [16, 128], strides = [1, 1]} : vector<16x1024xf32> to vector<16x128xf32>
    %9 = arith.addf %7, %8 : vector<16x128xf32>
    %10 = vector.extract_strided_slice %6 {offsets = [0, 256], sizes = [16, 128], strides = [1, 1]} : vector<16x1024xf32> to vector<16x128xf32>
    %11 = arith.addf %9, %10 : vector<16x128xf32>
    %12 = vector.extract_strided_slice %6 {offsets = [0, 384], sizes = [16, 128], strides = [1, 1]} : vector<16x1024xf32> to vector<16x128xf32>
    %13 = arith.addf %11, %12 : vector<16x128xf32>
    %14 = vector.extract_strided_slice %6 {offsets = [0, 512], sizes = [16, 128], strides = [1, 1]} : vector<16x1024xf32> to vector<16x128xf32>
    %15 = arith.addf %13, %14 : vector<16x128xf32>
    %16 = vector.extract_strided_slice %6 {offsets = [0, 640], sizes = [16, 128], strides = [1, 1]} : vector<16x1024xf32> to vector<16x128xf32>
    %17 = arith.addf %15, %16 : vector<16x128xf32>
    %18 = vector.extract_strided_slice %6 {offsets = [0, 768], sizes = [16, 128], strides = [1, 1]} : vector<16x1024xf32> to vector<16x128xf32>
    %19 = arith.addf %17, %18 : vector<16x128xf32>
    %20 = vector.extract_strided_slice %6 {offsets = [0, 896], sizes = [16, 128], strides = [1, 1]} : vector<16x1024xf32> to vector<16x128xf32>
    %21 = arith.addf %19, %20 : vector<16x128xf32>
    %c0_4 = arith.constant 0 : index
    %c0_5 = arith.constant 0 : index
    %22 = vector.load %arg6[%c0_4, %c0_5] : memref<16x128xf32, #tpu.memory_space<vmem>>, vector<16x128xf32>
    %23 = arith.addf %22, %21 : vector<16x128xf32>
    %c0_6 = arith.constant 0 : index
    %c0_7 = arith.constant 0 : index
    %24 = vector.load %arg6[%c0_6, %c0_7] : memref<16x128xf32, #tpu.memory_space<vmem>>, vector<16x128xf32>
    tpu.vector_store %arg6[%c0_6, %c0_7], %23 {strides = array<i32>} : memref<16x128xf32, #tpu.memory_space<vmem>>, vector<16x128xf32>,
    %c0_i32_8 = arith.constant 0 : i32
    %25 = arith.cmpi eq, %arg1, %c0_i32_8 : i32
    %26 = arith.extui %25 : i1 to i32
    %c0_i32_9 = arith.constant 0 : i32
    %27 = arith.cmpi ne, %26, %c0_i32_9 : i32
    scf.if %27 {
      %c0_10 = arith.constant 0 : index
      %c0_11 = arith.constant 0 : index
      %28 = vector.load %arg6[%c0_10, %c0_11] : memref<16x128xf32, #tpu.memory_space<vmem>>, vector<16x128xf32>
      %cst = arith.constant dense<0.000000e+00> : vector<16xf32>
      %29 = vector.multi_reduction <add>, %28, %cst [1] : vector<16x128xf32> to vector<16xf32>
      %30 = vector.shape_cast %29 : vector<16xf32> to vector<16x1xf32>
      %c0_12 = arith.constant 0 : index
      %c0_13 = arith.constant 0 : index
      %31 = vector.load %arg4[%c0_12, %c0_13] : memref<16x1xf32, #tpu.memory_space<vmem>>, vector<16x1xf32>
      %32 = arith.mulf %30, %31 : vector<16x1xf32>
      %c0_14 = arith.constant 0 : index
      %c0_15 = arith.constant 0 : index
      %33 = vector.load %arg5[%c0_14, %c0_15] : memref<16x1xf32, #tpu.memory_space<vmem>>, vector<16x1xf32>
      tpu.vector_store %arg5[%c0_14, %c0_15], %32 {strides = array<i32>} : memref<16x1xf32, #tpu.memory_space<vmem>>, vector<16x1xf32>,
    } else {
    }
    return
  }
  func.func @transform_0(%arg0: i32, %arg1: i32) -> (i32, i32) {
    %c0_i32 = arith.constant 0 : i32
    return %arg0, %arg1 : i32, i32
  }
  func.func @transform_1(%arg0: i32, %arg1: i32) -> (i32, i32) {
    %c0_i32 = arith.constant 0 : i32
    return %arg0, %arg1 : i32, i32
  }
  func.func @transform_2(%arg0: i32, %arg1: i32) -> (i32, i32) {
    %c0_i32 = arith.constant 0 : i32
    %c0_i32_0 = arith.constant 0 : i32
    return %arg0, %c0_i32 : i32, i32
  }
  func.func @transform_3(%arg0: i32, %arg1: i32) -> (i32, i32) {
    %c0_i32 = arith.constant 0 : i32
    %c0_i32_0 = arith.constant 0 : i32
    return %arg0, %c0_i32 : i32, i32
  }
}

</mosaic_0001>

<bundles_post_ra>
// kernel: tpu_custom_call.1
= control target key start
LH: loop header
LB: loop body
LE: loop exit
PB: predicated region body
PF: predicated region fallthrough
CT: control target
= control target key end

     0   :  { %8 = vsyncpa [#allocation4], 0  ;;  %s256_s0 = inlined_call_operand.hbm [shape: f32[16,1024], index: 0, kind: input, shape index: {}]   ;;  %s257_s1 = inlined_call_operand.hbm [shape: f32[16,1024], index: 1, kind: input, shape index: {}]   ;;  %s258_s2 = inlined_call_operand.vmem [shape: f32[16,1], index: 2, kind: input, shape index: {}]   ;;  %s259_s3 = inlined_call_operand.vmem [shape: f32[16,1], index: 3, kind: output, shape index: {}]  }
   0x1   :  { %s14_s14 = sshll.u32 %s256_s0, 4  ;;  %s15_s14 = int_to_ptr.hbm [resolvable:$true] %s14_s14 }
   0x2   :  { %9 = vsyncpa [#allocation6], 0  ;;  %s214_s15 = smov [#allocation3]   ;;  %s27_s19 = sshll.u32 %s257_s1, 4  ;;  %s28_s19 = int_to_ptr.hbm [resolvable:$true] %s27_s19 }
   0x3   :  { %s16_s16 = sshll.u32 %s214_s15, 4  ;;  %s215_s20 = smov 1024   ;;  %s17_s16 = int_to_ptr.vmem [resolvable:$true] %s16_s16 }
   0x4   :  { %s216_s21 = smov 64   ;;  %s217_s22 = smov [#allocation5]  }
   0x5   :  { %22 = dma.hbm_to_vmem [thread:$0]  %s15_s14, 2048, %s17_s16, [#allocation4], %s215_s20, %s215_s20, %s216_s21  }
   0x6   :  { %s29_s23 = sshll.u32 %s217_s22, 4  ;;  %s30_s23 = int_to_ptr.vmem [resolvable:$true] %s29_s23 }
   0x7   :  { %35 = dma.hbm_to_vmem [thread:$0]  %s28_s19, 2048, %s30_s23, [#allocation6], %s215_s20, %s215_s20, %s216_s21  }
   0x8   :  { %210 = dma.done.wait [#allocation4], 2048  }
   0x9   :  { %211 = vsyncadd [#allocation4], 4294965248 }
   0xa   :  { %212 = dma.done.wait [#allocation6], 2048  }
   0xb   :  { %213 = vsyncadd [#allocation6], 4294965248  ;;  %v52_v0 = vld [vmem:[#allocation3] sm:$0xff]  ;;  %v53_v1 = vld [vmem:[#allocation3 + $0x8] sm:$0xff]  ;;  %vm149_vm0 = vcmask 7168  }
   0xc   :  { %v54_v2 = vld [vmem:[#allocation3 + $0x10] sm:$0xff]  ;;  %v55_v3 = vld [vmem:[#allocation3 + $0x18] sm:$0xff]  ;;  %v56_v4 = vld [vmem:[#allocation3 + $0x20] sm:$0xff] }
   0xd   :  { %v68_v5 = vld [vmem:[#allocation5] sm:$0xff]  ;;  %v69_v6 = vld [vmem:[#allocation5 + $0x8] sm:$0xff]  ;;  %v70_v7 = vld [vmem:[#allocation5 + $0x10] sm:$0xff] }
   0xe   :  { %v71_v8 = vld [vmem:[#allocation5 + $0x18] sm:$0xff]  ;;  %v84_v9 = vsub.f32 %v52_v0, %v68_v5  ;;  %v72_v10 = vld [vmem:[#allocation5 + $0x20] sm:$0xff]  ;;  %v85_v11 = vsub.f32 %v53_v1, %v69_v6  ;;  %v86_v12 = vsub.f32 %v54_v2, %v70_v7  ;;  %v57_v14 = vld [vmem:[#allocation3 + $0x28] sm:$0xff] }
   0xf   :  { %v87_v13 = vsub.f32 %v55_v3, %v71_v8  ;;  %v58_v15 = vld [vmem:[#allocation3 + $0x30] sm:$0xff]  ;;  %v73_v16 = vld [vmem:[#allocation5 + $0x28] sm:$0xff]  ;;  %v88_v18 = vsub.f32 %v56_v4, %v72_v10  ;;  %v60_v21 = vld [vmem:[#allocation3 + $0x40] sm:$0xff] }
  0x10   :  { %v100_v17 = vmul.f32 %v84_v9, %v84_v9  ;;  %v101_v19 = vmul.f32 %v85_v11, %v85_v11  ;;  %v102_v20 = vmul.f32 %v86_v12, %v86_v12  ;;  %v61_v22 = vld [vmem:[#allocation3 + $0x48] sm:$0xff]  ;;  %v62_v23 = vld [vmem:[#allocation3 + $0x50] sm:$0xff]  ;;  %v59_v24 = vld [vmem:[#allocation3 + $0x38] sm:$0xff]  ;;  %v89_v28 = vsub.f32 %v57_v14, %v73_v16 }
  0x11   :  { %v74_v25 = vld [vmem:[#allocation5 + $0x30] sm:$0xff]  ;;  %v63_v26 = vld [vmem:[#allocation3 + $0x58] sm:$0xff]  ;;  %v64_v27 = vld [vmem:[#allocation3 + $0x60] sm:$0xff]  ;;  %v103_v29 = vmul.f32 %v87_v13, %v87_v13  ;;  %v104_v41 = vmul.f32 %v88_v18, %v88_v18 }
  0x12   :  { %v116_v30 = vadd.f32 %v101_v19, %v100_v17  ;;  %v76_v31 = vld [vmem:[#allocation5 + $0x40] sm:$0xff]  ;;  %v77_v32 = vld [vmem:[#allocation5 + $0x48] sm:$0xff]  ;;  %v78_v33 = vld [vmem:[#allocation5 + $0x50] sm:$0xff]  ;;  %v90_v40 = vsub.f32 %v58_v15, %v74_v25  ;;  %v105_v50 = vmul.f32 %v89_v28, %v89_v28 }
  0x13   :  { %v75_v34 = vld [vmem:[#allocation5 + $0x38] sm:$0xff]  ;;  %v80_v36 = vld [vmem:[#allocation5 + $0x60] sm:$0xff]  ;;  %v92_v37 = vsub.f32 %v60_v21, %v76_v31  ;;  %v93_v38 = vsub.f32 %v61_v22, %v77_v32  ;;  %v94_v39 = vsub.f32 %v62_v23, %v78_v33  ;;  %v65_v43 = vld [vmem:[#allocation3 + $0x68] sm:$0xff] }
  0x14   :  { %v79_v35 = vld [vmem:[#allocation5 + $0x58] sm:$0xff]  ;;  %v118_v42 = vadd.f32 %v116_v30, %v102_v20  ;;  %v81_v44 = vld [vmem:[#allocation5 + $0x68] sm:$0xff]  ;;  %v96_v46 = vsub.f32 %v64_v27, %v80_v36  ;;  %v91_v49 = vsub.f32 %v59_v24, %v75_v34  ;;  %v66_v52 = vld [vmem:[#allocation3 + $0x70] sm:$0xff]  ;;  %v106_v58 = vmul.f32 %v90_v40, %v90_v40 }
  0x15   :  { %v95_v45 = vsub.f32 %v63_v26, %v79_v35  ;;  %v108_v47 = vmul.f32 %v92_v37, %v92_v37  ;;  %v109_v48 = vmul.f32 %v93_v38, %v93_v38  ;;  %v82_v53 = vld [vmem:[#allocation5 + $0x70] sm:$0xff]  ;;  %v110_v54 = vmul.f32 %v94_v39, %v94_v39  ;;  %v67_v60 = vld [vmem:[#allocation3 + $0x78] sm:$0xff]  ;;  %v145_v14 = vld [vmem:[%s258_s2] sm:$0xff] }
  0x16   :  { %v120_v51 = vadd.f32 %v118_v42, %v103_v29  ;;  %v97_v55 = vsub.f32 %v65_v43, %v81_v44  ;;  %v83_v61 = vld [vmem:[#allocation5 + $0x78] sm:$0xff]  ;;  %v98_v62 = vsub.f32 %v66_v52, %v82_v53  ;;  %v112_v63 = vmul.f32 %v96_v46, %v96_v46  ;;  %v146_v17 = vld [vmem:[%s258_s2 + $0x8] sm:$0xff] }
  0x17   :  { %v111_v56 = vmul.f32 %v95_v45, %v95_v45  ;;  %v117_v57 = vadd.f32 %v109_v48, %v108_v47  ;;  %v107_v1 = vmul.f32 %v91_v49, %v91_v49  ;;  %v99_v6 = vsub.f32 %v67_v60, %v83_v61 }
  0x18   :  { %v122_v59 = vadd.f32 %v120_v51, %v104_v41  ;;  %v113_v3 = vmul.f32 %v97_v55, %v97_v55  ;;  %v114_v7 = vmul.f32 %v98_v62, %v98_v62 }
  0x19   :  { %v119_v0 = vadd.f32 %v117_v57, %v110_v54  ;;  %v115_v11 = vmul.f32 %v99_v6, %v99_v6 }
  0x1a   :  { %v124_v2 = vadd.f32 %v122_v59, %v105_v50 }
  0x1b   :  { %v121_v4 = vadd.f32 %v119_v0, %v111_v56 }
  0x1c   :  { %v126_v5 = vadd.f32 %v124_v2, %v106_v58 }
  0x1d   :  { %v123_v8 = vadd.f32 %v121_v4, %v112_v63 }
  0x1e   :  { %v128_v9 = vadd.f32 %v126_v5, %v107_v1 }
  0x1f   :  { %v125_v10 = vadd.f32 %v123_v8, %v113_v3 }
  0x20   :  { %141 = vadd.xlane.f32.xlu0 %v128_v9 }
  0x21   :  { %v127_v12 = vadd.f32 %v125_v10, %v114_v7 }
  0x23   :  { %v129_v13 = vadd.f32 %v127_v12, %v115_v11 }
  0x28   :  { %143 = vadd.xlane.f32.xlu0 %v129_v13 }
  0x93   :  { %v142_v15 = vpop.xlane.xlu0 %141 }
  0x94   :  { %v147_v16 = vmul.f32 %v145_v14, %v142_v15 }
  0x96   :  { %150 = vst.msk [vmem:[%s259_s3] sm:$0xff] %vm149_vm0, %v147_v16 }
  0x9b   :  { %v144_v18 = vpop.xlane.xlu0 %143 }
  0x9c   :  { %v148_v19 = vmul.f32 %v146_v17, %v144_v18 }
  0x9e   :  { %151 = vst.msk [vmem:[%s259_s3 + $0x8] sm:$0xff] %vm149_vm0, %v148_v19 }
  0x9f   :  { %156 = vsyncpa [#allocation4], 1 }
  0xa0   :  { %157 = vsyncpa [#allocation6], 1 }

</bundles_post_ra>
